<compile_context>
chip_gen: v7x
topology: tpu7x:2x2x1
jax: 0.10.0
libtpu: 0.0.40
codegen_flags: <defaults>
</compile_context>

<pallas_src>
import jax
import jax.numpy as jnp
from jax.experimental import pallas as pl
from jax.experimental.pallas import tpu as pltpu

BN_EPS = 1e-5


def _generator_kernel(x_ref, w_ref, gb_ref, o_ref):
    """One independent minibatch (one grid step) through all L layers.

    x_ref:  (B, D)     activation tile for this group
    w_ref:  (L, D, D)  all layer weights, pre-transposed to (in, out); VMEM-resident,
                       fetched once (constant index_map across the group grid axis)
    gb_ref: (L, 2, D)  packed BN params: row 0 = gamma, row 1 = beta
    o_ref:  (B, D)
    """
    x = x_ref[...].astype(jnp.float32)                      # (B, D)
    n_layers = w_ref.shape[0]
    inv_b = 1.0 / x_ref.shape[0]                            # static constant

    for l in range(n_layers):                               # static unroll over layers
        # Linear (bias omitted: cancelled exactly by training-mode BN mean subtraction).
        h = jnp.dot(x, w_ref[l], preferred_element_type=jnp.float32)   # (B, D)

        # One-pass training-mode BN stats: independent sums -> mu, biased var.
        s1 = jnp.sum(h, axis=0, keepdims=True)                          # (1, D)
        s2 = jnp.sum(h * h, axis=0, keepdims=True)                      # (1, D)
        mu = s1 * inv_b
        var = s2 * inv_b - mu * mu

        gamma = gb_ref[l, 0:1, :]                                       # (1, D)
        beta = gb_ref[l, 1:2, :]                                        # (1, D)
        scale = gamma * jax.lax.rsqrt(var + BN_EPS)                     # (1, D)
        shift = beta - mu * scale                                       # (1, D)

        act = jnp.maximum(h * scale + shift, 0.0)                       # fused affine + ReLU

        # Residual add for all but the final Linear/BN/ReLU block (static branch).
        x = act if l == n_layers - 1 else x + act

    o_ref[...] = x.astype(o_ref.dtype)


def generator_forward(x, weights, biases, gammas, betas):
    """Forward pass of the medgan Generator.

    x:        (B, D) one minibatch, or (G, B, D) G stacked independent minibatches
              (each group gets its own training-mode BN statistics, i.e. G module calls).
    weights:  (L, D, D) in PyTorch (out, in) convention.
    biases:   (L, D) accepted for API parity; unused (cancels under training-mode BN).
    gammas/betas: (L, D) BatchNorm affine parameters.
    """
    del biases
    squeeze = (x.ndim == 2)
    if squeeze:
        x = x[None]
    G, B, D = x.shape
    L = weights.shape[0]

    # Pre-transpose linear weights to (in, out); pack BN gamma/beta into one array so the
    # kernel has a single lane-aligned (L, 2, D) parameter tile.
    w_t = jnp.transpose(weights, (0, 2, 1)).astype(jnp.float32)     # (L, D, D)
    gb = jnp.stack([gammas, betas], axis=1).astype(jnp.float32)     # (L, 2, D)

    cost = pl.CostEstimate(
        flops=2 * G * L * B * D * D,
        transcendentals=G * L * D,
        bytes_accessed=L * D * D * 4 + 2 * G * B * D * 4 + L * 2 * D * 4,
    )

    out = pl.pallas_call(
        _generator_kernel,
        out_shape=jax.ShapeDtypeStruct((G, B, D), x.dtype),
        grid=(G,),
        in_specs=[
            pl.BlockSpec((None, B, D), lambda g: (g, 0, 0)),        # per-group activations
            pl.BlockSpec((L, D, D), lambda g: (0, 0, 0)),           # weights: fetched once
            pl.BlockSpec((L, 2, D), lambda g: (0, 0, 0)),           # packed gamma/beta: once
        ],
        out_specs=pl.BlockSpec((None, B, D), lambda g: (g, 0, 0)),
        compiler_params=pltpu.CompilerParams(
            dimension_semantics=("parallel",),                      # megacore across groups
        ),
        cost_estimate=cost,
    )(x, w_t, gb)

    return out[0] if squeeze else out


def generator_reference(x, weights, biases, gammas, betas):
    """Pure-JAX reference matching the PyTorch module (training-mode BN, bias included),
    applied independently per group."""
    squeeze = (x.ndim == 2)
    if squeeze:
        x = x[None]
    L = weights.shape[0]
    outs = []
    for g in range(x.shape[0]):
        h = x[g].astype(jnp.float32)
        for i in range(L):
            z = h @ weights[i].T.astype(jnp.float32) + biases[i]
            mu = z.mean(axis=0)
            var = ((z - mu) ** 2).mean(axis=0)
            zn = (z - mu) / jnp.sqrt(var + BN_EPS) * gammas[i] + betas[i]
            a = jnp.maximum(zn, 0.0)
            h = a if i == L - 1 else h + a
        outs.append(h.astype(x.dtype))
    out = jnp.stack(outs)
    return out[0] if squeeze else out


if __name__ == "__main__":
    # Generator(random_dim=128, hidden_dim=(128, 128, 128), bn_decay=0.99)
    #   -> 2 ResidualFC blocks + final Linear/BN/ReLU  => L = 3 stacked (128, 128) layers.
    # Per perf review: B = 128 rows per group fills the MXU tile height; G = 2 independent
    # minibatches share one kernel launch and one weight fetch.
    G, B, D = 2, 128, 128
    L = 3

    key = jax.random.PRNGKey(0)
    kx, kw, kb = jax.random.split(key, 3)

    x = jax.random.normal(kx, (G, B, D), dtype=jnp.float32)
    # Deterministic parameter init (PyTorch-like scale for Linear; BN gamma=1, beta=0).
    scale = 1.0 / jnp.sqrt(jnp.float32(D))
    weights = jax.random.uniform(kw, (L, D, D), jnp.float32, -scale, scale)   # (out, in)
    biases = jax.random.uniform(kb, (L, D), jnp.float32, -scale, scale)
    gammas = jnp.ones((L, D), jnp.float32)
    betas = jnp.zeros((L, D), jnp.float32)

    out = generator_forward(x, weights, biases, gammas, betas)
    out = jax.block_until_ready(out)

    ref = generator_reference(x, weights, biases, gammas, betas)
    assert out.shape == (G, B, D)
    assert jnp.allclose(out, ref, atol=1e-4, rtol=1e-4), "mismatch vs pure-JAX reference"

    # Also exercise the single-minibatch (B, D) path.
    out2 = jax.block_until_ready(generator_forward(x[0], weights, biases, gammas, betas))
    ref2 = generator_reference(x[0], weights, biases, gammas, betas)
    assert out2.shape == (B, D)
    assert jnp.allclose(out2, ref2, atol=1e-4, rtol=1e-4), "mismatch vs reference (2-D path)"

    print("KERNEL_OK")
</pallas_src>

<mosaic_0001>
module attributes {stable_mosaic.version = 11 : i64} {
  func.func @_generator_kernel(%arg0: i32, %arg1: memref<1x128x128xf32, #tpu.memory_space<vmem>>, %arg2: memref<3x128x128xf32, #tpu.memory_space<vmem>>, %arg3: memref<3x2x128xf32, #tpu.memory_space<vmem>>, %arg4: memref<1x128x128xf32, #tpu.memory_space<vmem>>) attributes {dimension_semantics = [#tpu.dimension_semantics<parallel>], iteration_bounds = array<i64: 2>, scalar_prefetch = 0 : i64, scratch_operands = 0 : i64, tpu.core_type = #tpu.core_type<tc>, window_params = [{transform_indices = @transform_0, window_bounds = array<i64: 1, 128, 128>}, {pipeline_mode = #tpu.pipeline_mode<synchronous>, transform_indices = @transform_1, window_bounds = array<i64: 3, 128, 128>}, {pipeline_mode = #tpu.pipeline_mode<synchronous>, transform_indices = @transform_2, window_bounds = array<i64: 3, 2, 128>}, {transform_indices = @transform_3, window_bounds = array<i64: 1, 128, 128>}]} {
    %c0 = arith.constant 0 : index
    %c0_0 = arith.constant 0 : index
    %c0_1 = arith.constant 0 : index
    %0 = vector.load %arg1[%c0, %c0_0, %c0_1] : memref<1x128x128xf32, #tpu.memory_space<vmem>>, vector<1x128x128xf32>
    %1 = vector.shape_cast %0 : vector<1x128x128xf32> to vector<128x128xf32>
    %c0_2 = arith.constant 0 : index
    %c0_3 = arith.constant 0 : index
    %c0_4 = arith.constant 0 : index
    %2 = vector.load %arg2[%c0_2, %c0_3, %c0_4] : memref<3x128x128xf32, #tpu.memory_space<vmem>>, vector<1x128x128xf32>
    %3 = vector.shape_cast %2 : vector<1x128x128xf32> to vector<128x128xf32>
    %cst = arith.constant dense<0.000000e+00> : vector<128x128xf32>
    %4 = tpu.matmul %1, %3, %cst {dimension_numbers = #tpu.dot_dimension_numbers<[1], [0], [0], [1], [0, 0, 1, 1], [], []>} : vector<128x128xf32>, vector<128x128xf32>, vector<128x128xf32> -> vector<128x128xf32>
    %cst_5 = arith.constant dense<0.000000e+00> : vector<128xf32>
    %5 = vector.multi_reduction <add>, %4, %cst_5 [0] : vector<128x128xf32> to vector<128xf32>
    %6 = vector.shape_cast %5 : vector<128xf32> to vector<1x128xf32>
    %7 = arith.mulf %4, %4 : vector<128x128xf32>
    %cst_6 = arith.constant dense<0.000000e+00> : vector<128xf32>
    %8 = vector.multi_reduction <add>, %7, %cst_6 [0] : vector<128x128xf32> to vector<128xf32>
    %9 = vector.shape_cast %8 : vector<128xf32> to vector<1x128xf32>
    %cst_7 = arith.constant 7.812500e-03 : f32
    %10 = vector.broadcast %cst_7 : f32 to vector<1x128xf32>
    %11 = arith.mulf %6, %10 : vector<1x128xf32>
    %cst_8 = arith.constant 7.812500e-03 : f32
    %12 = vector.broadcast %cst_8 : f32 to vector<1x128xf32>
    %13 = arith.mulf %9, %12 : vector<1x128xf32>
    %14 = arith.mulf %11, %11 : vector<1x128xf32>
    %15 = arith.subf %13, %14 : vector<1x128xf32>
    %c0_9 = arith.constant 0 : index
    %c0_10 = arith.constant 0 : index
    %c0_11 = arith.constant 0 : index
    %16 = vector.load %arg3[%c0_9, %c0_10, %c0_11] : memref<3x2x128xf32, #tpu.memory_space<vmem>>, vector<1x1x128xf32>
    %17 = vector.shape_cast %16 : vector<1x1x128xf32> to vector<1x128xf32>
    %c0_12 = arith.constant 0 : index
    %c1 = arith.constant 1 : index
    %c0_13 = arith.constant 0 : index
    %18 = vector.load %arg3[%c0_12, %c1, %c0_13] : memref<3x2x128xf32, #tpu.memory_space<vmem>>, vector<1x1x128xf32>
    %19 = vector.shape_cast %18 : vector<1x1x128xf32> to vector<1x128xf32>
    %cst_14 = arith.constant 9.99999974E-6 : f32
    %20 = vector.broadcast %cst_14 : f32 to vector<1x128xf32>
    %21 = arith.addf %15, %20 : vector<1x128xf32>
    %22 = math.rsqrt %21 : vector<1x128xf32>
    %23 = arith.mulf %17, %22 : vector<1x128xf32>
    %24 = arith.mulf %11, %23 : vector<1x128xf32>
    %25 = arith.subf %19, %24 : vector<1x128xf32>
    %26 = vector.broadcast %23 : vector<1x128xf32> to vector<128x128xf32>
    %27 = arith.mulf %4, %26 : vector<128x128xf32>
    %28 = vector.broadcast %25 : vector<1x128xf32> to vector<128x128xf32>
    %29 = arith.addf %27, %28 : vector<128x128xf32>
    %cst_15 = arith.constant 0.000000e+00 : f32
    %30 = vector.broadcast %cst_15 : f32 to vector<128x128xf32>
    %31 = arith.maximumf %29, %30 : vector<128x128xf32>
    %32 = arith.addf %1, %31 : vector<128x128xf32>
    %c1_16 = arith.constant 1 : index
    %c0_17 = arith.constant 0 : index
    %c0_18 = arith.constant 0 : index
    %33 = vector.load %arg2[%c1_16, %c0_17, %c0_18] : memref<3x128x128xf32, #tpu.memory_space<vmem>>, vector<1x128x128xf32>
    %34 = vector.shape_cast %33 : vector<1x128x128xf32> to vector<128x128xf32>
    %cst_19 = arith.constant dense<0.000000e+00> : vector<128x128xf32>
    %35 = tpu.matmul %32, %34, %cst_19 {dimension_numbers = #tpu.dot_dimension_numbers<[1], [0], [0], [1], [0, 0, 1, 1], [], []>} : vector<128x128xf32>, vector<128x128xf32>, vector<128x128xf32> -> vector<128x128xf32>
    %cst_20 = arith.constant dense<0.000000e+00> : vector<128xf32>
    %36 = vector.multi_reduction <add>, %35, %cst_20 [0] : vector<128x128xf32> to vector<128xf32>
    %37 = vector.shape_cast %36 : vector<128xf32> to vector<1x128xf32>
    %38 = arith.mulf %35, %35 : vector<128x128xf32>
    %cst_21 = arith.constant dense<0.000000e+00> : vector<128xf32>
    %39 = vector.multi_reduction <add>, %38, %cst_21 [0] : vector<128x128xf32> to vector<128xf32>
    %40 = vector.shape_cast %39 : vector<128xf32> to vector<1x128xf32>
    %cst_22 = arith.constant 7.812500e-03 : f32
    %41 = vector.broadcast %cst_22 : f32 to vector<1x128xf32>
    %42 = arith.mulf %37, %41 : vector<1x128xf32>
    %cst_23 = arith.constant 7.812500e-03 : f32
    %43 = vector.broadcast %cst_23 : f32 to vector<1x128xf32>
    %44 = arith.mulf %40, %43 : vector<1x128xf32>
    %45 = arith.mulf %42, %42 : vector<1x128xf32>
    %46 = arith.subf %44, %45 : vector<1x128xf32>
    %c1_24 = arith.constant 1 : index
    %c0_25 = arith.constant 0 : index
    %c0_26 = arith.constant 0 : index
    %47 = vector.load %arg3[%c1_24, %c0_25, %c0_26] : memref<3x2x128xf32, #tpu.memory_space<vmem>>, vector<1x1x128xf32>
    %48 = vector.shape_cast %47 : vector<1x1x128xf32> to vector<1x128xf32>
    %c1_27 = arith.constant 1 : index
    %c1_28 = arith.constant 1 : index
    %c0_29 = arith.constant 0 : index
    %49 = vector.load %arg3[%c1_27, %c1_28, %c0_29] : memref<3x2x128xf32, #tpu.memory_space<vmem>>, vector<1x1x128xf32>
    %50 = vector.shape_cast %49 : vector<1x1x128xf32> to vector<1x128xf32>
    %cst_30 = arith.constant 9.99999974E-6 : f32
    %51 = vector.broadcast %cst_30 : f32 to vector<1x128xf32>
    %52 = arith.addf %46, %51 : vector<1x128xf32>
    %53 = math.rsqrt %52 : vector<1x128xf32>
    %54 = arith.mulf %48, %53 : vector<1x128xf32>
    %55 = arith.mulf %42, %54 : vector<1x128xf32>
    %56 = arith.subf %50, %55 : vector<1x128xf32>
    %57 = vector.broadcast %54 : vector<1x128xf32> to vector<128x128xf32>
    %58 = arith.mulf %35, %57 : vector<128x128xf32>
    %59 = vector.broadcast %56 : vector<1x128xf32> to vector<128x128xf32>
    %60 = arith.addf %58, %59 : vector<128x128xf32>
    %cst_31 = arith.constant 0.000000e+00 : f32
    %61 = vector.broadcast %cst_31 : f32 to vector<128x128xf32>
    %62 = arith.maximumf %60, %61 : vector<128x128xf32>
    %63 = arith.addf %32, %62 : vector<128x128xf32>
    %c2 = arith.constant 2 : index
    %c0_32 = arith.constant 0 : index
    %c0_33 = arith.constant 0 : index
    %64 = vector.load %arg2[%c2, %c0_32, %c0_33] : memref<3x128x128xf32, #tpu.memory_space<vmem>>, vector<1x128x128xf32>
    %65 = vector.shape_cast %64 : vector<1x128x128xf32> to vector<128x128xf32>
    %cst_34 = arith.constant dense<0.000000e+00> : vector<128x128xf32>
    %66 = tpu.matmul %63, %65, %cst_34 {dimension_numbers = #tpu.dot_dimension_numbers<[1], [0], [0], [1], [0, 0, 1, 1], [], []>} : vector<128x128xf32>, vector<128x128xf32>, vector<128x128xf32> -> vector<128x128xf32>
    %cst_35 = arith.constant dense<0.000000e+00> : vector<128xf32>
    %67 = vector.multi_reduction <add>, %66, %cst_35 [0] : vector<128x128xf32> to vector<128xf32>
    %68 = vector.shape_cast %67 : vector<128xf32> to vector<1x128xf32>
    %69 = arith.mulf %66, %66 : vector<128x128xf32>
    %cst_36 = arith.constant dense<0.000000e+00> : vector<128xf32>
    %70 = vector.multi_reduction <add>, %69, %cst_36 [0] : vector<128x128xf32> to vector<128xf32>
    %71 = vector.shape_cast %70 : vector<128xf32> to vector<1x128xf32>
    %cst_37 = arith.constant 7.812500e-03 : f32
    %72 = vector.broadcast %cst_37 : f32 to vector<1x128xf32>
    %73 = arith.mulf %68, %72 : vector<1x128xf32>
    %cst_38 = arith.constant 7.812500e-03 : f32
    %74 = vector.broadcast %cst_38 : f32 to vector<1x128xf32>
    %75 = arith.mulf %71, %74 : vector<1x128xf32>
    %76 = arith.mulf %73, %73 : vector<1x128xf32>
    %77 = arith.subf %75, %76 : vector<1x128xf32>
    %c2_39 = arith.constant 2 : index
    %c0_40 = arith.constant 0 : index
    %c0_41 = arith.constant 0 : index
    %78 = vector.load %arg3[%c2_39, %c0_40, %c0_41] : memref<3x2x128xf32, #tpu.memory_space<vmem>>, vector<1x1x128xf32>
    %79 = vector.shape_cast %78 : vector<1x1x128xf32> to vector<1x128xf32>
    %c2_42 = arith.constant 2 : index
    %c1_43 = arith.constant 1 : index
    %c0_44 = arith.constant 0 : index
    %80 = vector.load %arg3[%c2_42, %c1_43, %c0_44] : memref<3x2x128xf32, #tpu.memory_space<vmem>>, vector<1x1x128xf32>
    %81 = vector.shape_cast %80 : vector<1x1x128xf32> to vector<1x128xf32>
    %cst_45 = arith.constant 9.99999974E-6 : f32
    %82 = vector.broadcast %cst_45 : f32 to vector<1x128xf32>
    %83 = arith.addf %77, %82 : vector<1x128xf32>
    %84 = math.rsqrt %83 : vector<1x128xf32>
    %85 = arith.mulf %79, %84 : vector<1x128xf32>
    %86 = arith.mulf %73, %85 : vector<1x128xf32>
    %87 = arith.subf %81, %86 : vector<1x128xf32>
    %88 = vector.broadcast %85 : vector<1x128xf32> to vector<128x128xf32>
    %89 = arith.mulf %66, %88 : vector<128x128xf32>
    %90 = vector.broadcast %87 : vector<1x128xf32> to vector<128x128xf32>
    %91 = arith.addf %89, %90 : vector<128x128xf32>
    %cst_46 = arith.constant 0.000000e+00 : f32
    %92 = vector.broadcast %cst_46 : f32 to vector<128x128xf32>
    %93 = arith.maximumf %91, %92 : vector<128x128xf32>
    %c0_47 = arith.constant 0 : index
    %c0_48 = arith.constant 0 : index
    %c0_49 = arith.constant 0 : index
    %94 = vector.load %arg4[%c0_47, %c0_48, %c0_49] : memref<1x128x128xf32, #tpu.memory_space<vmem>>, vector<1x128x128xf32>
    %95 = vector.shape_cast %94 : vector<1x128x128xf32> to vector<128x128xf32>
    %96 = vector.shape_cast %93 : vector<128x128xf32> to vector<1x128x128xf32>
    tpu.vector_store %arg4[%c0_47, %c0_48, %c0_49], %96 {strides = array<i32>} : memref<1x128x128xf32, #tpu.memory_space<vmem>>, vector<1x128x128xf32>,
    return
  }
  func.func @transform_0(%arg0: i32) -> (i32, i32, i32) {
    %c0_i32 = arith.constant 0 : i32
    %c0_i32_0 = arith.constant 0 : i32
    %c0_i32_1 = arith.constant 0 : i32
    return %arg0, %c0_i32, %c0_i32_0 : i32, i32, i32
  }
  func.func @transform_1(%arg0: i32) -> (i32, i32, i32) {
    %c0_i32 = arith.constant 0 : i32
    %c0_i32_0 = arith.constant 0 : i32
    %c0_i32_1 = arith.constant 0 : i32
    %c0_i32_2 = arith.constant 0 : i32
    return %c0_i32, %c0_i32_0, %c0_i32_1 : i32, i32, i32
  }
  func.func @transform_2(%arg0: i32) -> (i32, i32, i32) {
    %c0_i32 = arith.constant 0 : i32
    %c0_i32_0 = arith.constant 0 : i32
    %c0_i32_1 = arith.constant 0 : i32
    %c0_i32_2 = arith.constant 0 : i32
    return %c0_i32, %c0_i32_0, %c0_i32_1 : i32, i32, i32
  }
  func.func @transform_3(%arg0: i32) -> (i32, i32, i32) {
    %c0_i32 = arith.constant 0 : i32
    %c0_i32_0 = arith.constant 0 : i32
    %c0_i32_1 = arith.constant 0 : i32
    return %arg0, %c0_i32, %c0_i32_0 : i32, i32, i32
  }
}

</mosaic_0001>

<bundles_post_ra>
// kernel: tpu_custom_call.1
= control target key start
LH: loop header
LB: loop body
LE: loop exit
PB: predicated region body
PF: predicated region fallthrough
CT: control target
= control target key end

     0   :  { %8 = vsyncpa [#allocation3], 0  ;;  %s2485_s0 = inlined_call_operand.hbm [shape: f32[2,128,128], index: 0, kind: input, shape index: {}]   ;;  %s2486_s1 = inlined_call_operand.hbm [shape: f32[3,128,128], index: 1, kind: input, shape index: {}]   ;;  %s2487_s2 = inlined_call_operand.vmem [shape: f32[3,2,128], index: 2, kind: input, shape index: {}]   ;;  %s2488_s3 = inlined_call_operand.hbm [shape: f32[2,128,128], index: 3, kind: output, shape index: {}]  }
   0x1   :  { %10 = vsyncpa [#allocation3 + $0x1], 0 }
   0x2   :  { %11 = vsyncpa [#allocation6], 0 }
   0x3   :  { %12 = vsyncpa [#allocation4], 0 }
   0x4   :  { %14 = vsyncpa [#allocation4 + $0x1], 0  ;;  %s1849_s12 = smov 0   ;;  %s1851_s13 = smov 0  }
   0x5   :  { %s1853_s14 = smov 0   ;;  %s1855_s15 = smov 0  }
   0x6 LB: > { %s1870_s16 = sadd.s32 4294967295, %s1820_s15   ;;  %s1227_s17 = sadd.s32 4294967294, %s1820_s15   ;;  %s1820_s15 = sphi %s1855_s15, %s2508_s15   ;;  %s1816_s14 = sphi %s1853_s14, %s2507_s14   ;;  %s1812_s13 = sphi %s1851_s13, %s2506_s13   ;;  %s1808_s12 = sphi %s1849_s12, %s2505_s12  }
   0x7   : > { %p40_p0 = scmp.ne.s32.totalorder %s1812_s13, %s1808_s12  ;;  %p2489_p1 = scmp.eq.s32.totalorder %s1870_s16, 0 }
   0x8   : > { %p112_p3 = scmp.eq.s32.totalorder %s1227_s17, 1  ;;  %p1228_p5 = scmp.ge.s32.totalorder %s1820_s15, 1 }
   0x9   : > { %p1879_p4 = por %p2489_p1, %p40_p0  ;;  %p119_p7 = scmp.lt.s32.totalorder %s1820_s15, 3 }
   0xa   : > { %p1884_p6 = por %p112_p3, %p40_p0  ;;  %s1822_s21 = smov [#allocation5]  }
   0xb   : > { %s2492_s18 = scalar_select %p1879_p4, 1, 0 }
   0xc   : > { %s2493_s19 = scalar_select %p1884_p6, 1, 0 }
   0xd   : > { %p1889_p8 = pnand %p1228_p5, %p119_p7  ;;  %s131_s22 = sshll.u32 %s1822_s21, 4  ;;  %s1893_s22 = int_to_ptr.vmem [resolvable:$true] %s131_s22 }
   0xe   : > { %s1905_s24 = sadd.s32 1, %s1820_s15   ;;  %s27_s25 = sadd.s32 1, %s1816_s14 }
   0xf   : > { %s2494_s20 = scalar_select %p1889_p8, 1, 0 }
  0x10   : > { %p1633_p9 = pneg %p1889_p8  ;;  %s24_s26 = ssub.s32 %s1820_s15, %s1905_s24 }
  0x11   : > { %s1692_s29 = scalar_lea.hbm %s2486_s1, 6144 }
  0x12   : > { %p1900_p11 = pnand %p1633_p9, %p2489_p1  ;;  %p1693_p12 = scmp.ne.s32.totalorder %s2486_s1, %s1692_s29 }
  0x13   : > { %p1699_p5 = scmp.lt.u32.totalorder %s1692_s29, %s2486_s1 }
  0x14   : > { %p1694_p13 = pneg %p1900_p11 }
  0x16   : > { %p1695_p0 = pnand %p1694_p13, %p1693_p12 }
  0x18   : > { %p1696_p3 = pneg %p1695_p0 }
  0x1a   : > { %p1701_p7 = pnand %p1699_p5, %p1696_p3 }
  0x1c   : > { %1704 = shalt.err (!%p1701_p7)
}
  0x1d   : > { %s1705_s7 = scalar_lea.vmem %s1893_s22, 6144  ;;  %p1713_p2 = scmp.lt.s32.totalorder %s1893_s22, %s1893_s22 }
  0x1e   : > { %p1706_p9 = scmp.ne.s32.totalorder %s1893_s22, %s1705_s7  ;;  %p1714_p6 = scmp.lt.s32.totalorder %s1705_s7, %s1705_s7 }
  0x20   : > { %p1708_p10 = pnand %p1706_p9, %p1694_p13  ;;  %p1715_p4 = por %p1714_p6, %p1713_p2 }
  0x22   : > { %p1709_p1 = pneg %p1708_p10 }
  0x24   : > { %p1716_p8 = pnand %p1715_p4, %p1709_p1 }
  0x26   : > { %1719 = shalt.err (!%p1716_p8)
}
  0x27   : > { %s1823_s8 = smov 128   ;;  %s1824_s9 = smov 8  }
  0x28   : > { %1636 = dma.hbm_to_vmem [thread:$0]  (!%p1900_p11), %s2486_s1, 6144, %s1893_s22, [#allocation6], %s1823_s8, %s1823_s8, %s1824_s9  }
  0x29   : > { %p25_p1 = scmp.eq.s32.totalorder %s24_s26, 0  ;;  %p34_p2 = scmp.ne.s32.totalorder %s1816_s14, %s1812_s13 }
  0x2a   : > { %p35_p4 = scmp.eq.s32.totalorder %s1820_s15, 0  ;;  %p1646_p6 = scmp.lt.s32.totalorder %s1820_s15, 2 }
  0x2b   : > { %s1939_s17 = scalar_select %p25_p1, %s1816_s14, %s27_s25  }
  0x2c   : > { %p36_p8 = por %p35_p4, %p34_p2  ;;  %p2496_p10 = scmp.eq.s32.totalorder %s1870_s16, 1 }
  0x2d   : > { %s148_s23 = sand.u32 1, %s1816_s14   ;;  %s1247_s27 = sshll.u32 %s1820_s15, 11 }
  0x2e   : > { %p1943_p12 = por %p2496_p10, %p34_p2  ;;  %s1231_s28 = sshll.u32 %s148_s23, 7 }
  0x2f   : > { %s1952_s4 = scalar_lea.hbm %s2485_s0, %s1247_s27  ;;  %s152_s22 = scalar_lea.vmem [#allocation2], %s1231_s28 }
  0x30   : > { %s159_s25 = sshll.u32 %s152_s22, 4  ;;  %p1954_p11 = pnand %p1646_p6, %p36_p8  ;;  %s1958_s25 = int_to_ptr.vmem [resolvable:$true] %s159_s25 }
  0x31   : > { %s1960_s5 = scalar_lea.sflag [#allocation3], %s148_s23  ;;  %s1720_s6 = scalar_lea.hbm %s1952_s4, 2048 }
  0x32   : > { %p1721_p13 = scmp.ne.s32.totalorder %s1952_s4, %s1720_s6  ;;  %p1722_p0 = pneg %p1954_p11 }
  0x33   : > { %s1725_s11 = scalar_lea.hbm %s2485_s0, 4096  ;;  %p1726_p7 = scmp.lt.u32.totalorder %s1952_s4, %s2485_s0 }
  0x34   : > { %p1723_p3 = pnand %p1722_p0, %p1721_p13  ;;  %p1727_p9 = scmp.lt.u32.totalorder %s1725_s11, %s1720_s6 }
  0x35   : > { %p1729_p2 = scmp.lt.u32.totalorder %s1720_s6, %s1952_s4 }
  0x36   : > { %p1724_p5 = pneg %p1723_p3  ;;  %p1728_p1 = por %p1727_p9, %p1726_p7 }
  0x38   : > { %p1730_p4 = por %p1729_p2, %p1728_p1 }
  0x3a   : > { %p1731_p6 = pnand %p1730_p4, %p1724_p5 }
  0x3c   : > { %1734 = shalt.err (!%p1731_p6)
}
  0x3d   : > { %s1735_s23 = scalar_lea.vmem %s1958_s25, 2048  ;;  %s1825_s29 = smov [#allocation2]  }
  0x3e   : > { %p1736_p8 = scmp.ne.s32.totalorder %s1958_s25, %s1735_s23  ;;  %s1740_s30 = sshll.u32 %s1825_s29, 4  ;;  %s1741_s30 = int_to_ptr.vmem [resolvable:$false] %s1740_s30 }
  0x3f   : > { %s1742_s22 = scalar_lea.vmem %s1741_s30, 4096  ;;  %p1743_p3 = scmp.lt.s32.totalorder %s1958_s25, %s1741_s30 }
  0x40   : > { %p1738_p10 = pnand %p1736_p8, %p1722_p0  ;;  %p1744_p7 = scmp.lt.s32.totalorder %s1742_s22, %s1735_s23 }
  0x42   : > { %p1739_p13 = pneg %p1738_p10  ;;  %p1745_p9 = por %p1744_p7, %p1743_p3 }
  0x44   : > { %p1746_p1 = pnand %p1745_p9, %p1739_p13 }
  0x46   : > { %1749 = shalt.err (!%p1746_p1)
}
  0x47   : > { %1640 = dma.hbm_to_vmem [thread:$0]  (!%p1954_p11), %s1952_s4, 2048, %s1958_s25, %s1960_s5, %s1823_s8, %s1823_s8, %s1824_s9  }
  0x48   : > { %p2499_p0 = scmp.ne.s32.totalorder %s2494_s20, 0 }
  0x49   : > { %s1994_s6 = sand.u32 (!%p2499_p0), 1, %s1812_s13   ;;  %p2500_p5 = scmp.ne.s32.totalorder (!%p2499_p0), %s2492_s18, 0 }
  0x4a   : > { %171 = sbr.rel (%p2499_p0) target bundleno = 1014 (0x3f6), region = 32  ;;  %s1235_s7 = sshll.u32 (!%p2499_p0), %s1994_s6, 7 }
  0x4b   : > { %s174_s10 = scalar_lea.sflag (!%p2499_p0), [#allocation3], %s1994_s6  ;;  %s2000_s26 = scalar_lea.vmem (!%p2499_p0), [#allocation2], %s1235_s7 }
  0x51   : > { %1795 = dma.done.wait (%p2500_p5), %s174_s10, 2048  }
  0x52   : > { %1797 = vsyncadd (%p2500_p5), %s174_s10, 4294965248  ;;  %p2501_p11 = scmp.eq.s32.totalorder %s1870_s16, 0 }
  0x54   : > { %1799 = dma.done.wait (%p2501_p11), [#allocation6], 6144   ;;  %p2502_p2 = pmov %p2501_p11 }
  0x55   : > { %v220_v0 = vld [vmem:[#allocation5] sm:$0xff]  ;;  %v221_v1 = vld [vmem:[#allocation5 + $0x8] sm:$0xff]  ;;  %v222_v2 = vld [vmem:[#allocation5 + $0x10] sm:$0xff]  ;;  %s2416_s30 = scalar_lea.vmem [#allocation7], %s1235_s7  ;;  %s1248_s22 = sshll.u32 %s1870_s16, 11 }
  0x56   : > { %1801 = vsyncadd (%p2502_p2), [#allocation6], 4294961152  ;;  %v1513_v3 = vpack.c.bf16 %v221_v1, %v220_v0  ;;  %v223_v4 = vld [vmem:[#allocation5 + $0x18] sm:$0xff]  ;;  %v224_v6 = vld [vmem:[#allocation5 + $0x20] sm:$0xff]  ;;  %s1144_s10 = sshll.u32 %s2416_s30, 4  ;;  %s1131_s18 = scalar_lea.sflag [#allocation4], %s1994_s6  ;;  %s2431_s10 = int_to_ptr.vmem [resolvable:$true] %s1144_s10 }
  0x57   : > { %v1517_v5 = vpack.c.bf16 %v223_v4, %v222_v2  ;;  %v225_v7 = vld [vmem:[#allocation5 + $0x28] sm:$0xff]  ;;  %v2011_v9 = vld [vmem:[%s2000_s26] sm:$0xff]  ;;  %v226_v10 = vld [vmem:[#allocation5 + $0x30] sm:$0xff]  ;;  %s1750_s20 = scalar_lea.vmem %s2431_s10, 2048  ;;  %s1826_s8 = smov [#allocation7]  }
  0x58   : > { %1514 = vmatprep.subr.bf16.mxu0 %v1513_v3  ;;  %v1521_v8 = vpack.c.bf16 %v225_v7, %v224_v6  ;;  %v227_v11 = vld [vmem:[#allocation5 + $0x38] sm:$0xff]  ;;  %1377 = vmatprep.mubr.f32.mxu0 %v2011_v9  ;;  %v228_v13 = vld [vmem:[#allocation5 + $0x40] sm:$0xff]  ;;  %v229_v14 = vld [vmem:[#allocation5 + $0x48] sm:$0xff]  ;;  %p1751_p4 = scmp.ne.s32.totalorder %s2431_s10, %s1750_s20  ;;  %s1754_s9 = sshll.u32 %s1826_s8, 4  ;;  %s1755_s9 = int_to_ptr.vmem [resolvable:$false] %s1754_s9 }
  0x59   : > { %1516 = vmatpush3.bf16.msra.mxu0 %v1513_v3  ;;  %v1525_v12 = vpack.c.bf16 %v227_v11, %v226_v10  ;;  %v1529_v15 = vpack.c.bf16 %v229_v14, %v228_v13  ;;  %v230_v16 = vld [vmem:[#allocation5 + $0x50] sm:$0xff]  ;;  %v231_v17 = vld [vmem:[#allocation5 + $0x58] sm:$0xff]  ;;  %v232_v19 = vld [vmem:[#allocation5 + $0x60] sm:$0xff]  ;;  %s1756_s4 = scalar_lea.vmem %s1755_s9, 4096  ;;  %p1757_p10 = scmp.lt.s32.totalorder %s2431_s10, %s1755_s9 }
  0x5a   : > { %1518 = vmatprep.subr.bf16.mxu0 %v1517_v5  ;;  %v1533_v18 = vpack.c.bf16 %v231_v17, %v230_v16  ;;  %v233_v20 = vld [vmem:[#allocation5 + $0x68] sm:$0xff]  ;;  %v234_v22 = vld [vmem:[#allocation5 + $0x70] sm:$0xff]  ;;  %v235_v23 = vld [vmem:[#allocation5 + $0x78] sm:$0xff]  ;;  %p1752_p6 = pnand %p1751_p4, %p1943_p12  ;;  %p1758_p13 = scmp.lt.s32.totalorder %s1756_s4, %s1750_s20 }
  0x5b   : > { %v1537_v21 = vpack.c.bf16 %v233_v20, %v232_v19  ;;  %v1541_v24 = vpack.c.bf16 %v235_v23, %v234_v22  ;;  %v2015_v25 = vld [vmem:[%s2000_s26 + $0x8] sm:$0xff]  ;;  %v2018_v26 = vld [vmem:[%s2000_s26 + $0x10] sm:$0xff]  ;;  %v2023_v27 = vld [vmem:[%s2000_s26 + $0x18] sm:$0xff] }
  0x5c   : > { %v2026_v28 = vld [vmem:[%s2000_s26 + $0x20] sm:$0xff]  ;;  %v2031_v29 = vld [vmem:[%s2000_s26 + $0x28] sm:$0xff]  ;;  %v2034_v30 = vld [vmem:[%s2000_s26 + $0x30] sm:$0xff]  ;;  %p1753_p8 = pneg %p1752_p6  ;;  %p1759_p3 = por %p1758_p13, %p1757_p10 }
  0x5d   : > { %1520 = vmatpush3.bf16.msra.mxu0 %v1517_v5  ;;  %v2039_v31 = vld [vmem:[%s2000_s26 + $0x38] sm:$0xff]  ;;  %v2042_v32 = vld [vmem:[%s2000_s26 + $0x40] sm:$0xff]  ;;  %v2047_v33 = vld [vmem:[%s2000_s26 + $0x48] sm:$0xff] }
  0x5e   : > { %1522 = vmatprep.subr.bf16.mxu0 %v1521_v8  ;;  %v2050_v34 = vld [vmem:[%s2000_s26 + $0x50] sm:$0xff]  ;;  %v2055_v35 = vld [vmem:[%s2000_s26 + $0x58] sm:$0xff]  ;;  %v2058_v36 = vld [vmem:[%s2000_s26 + $0x60] sm:$0xff]  ;;  %p1760_p7 = pnand %p1759_p3, %p1753_p8 }
  0x5f   : > { %v2063_v37 = vld [vmem:[%s2000_s26 + $0x68] sm:$0xff]  ;;  %v2066_v38 = vld [vmem:[%s2000_s26 + $0x70] sm:$0xff]  ;;  %v2071_v39 = vld [vmem:[%s2000_s26 + $0x78] sm:$0xff]  ;;  %s2429_s26 = scalar_lea.hbm %s2488_s3, %s1248_s22 }
  0x60   : > { %v523_v40 = vld [vmem:[#allocation5 + $0x80] sm:$0xff]  ;;  %v524_v41 = vld [vmem:[#allocation5 + $0x88] sm:$0xff]  ;;  %v525_v43 = vld [vmem:[#allocation5 + $0x90] sm:$0xff] }
  0x61   : > { %1524 = vmatpush3.bf16.msra.mxu0 %v1521_v8  ;;  %v1545_v42 = vpack.c.bf16 %v524_v41, %v523_v40  ;;  %v526_v44 = vld [vmem:[#allocation5 + $0x98] sm:$0xff]  ;;  %v527_v46 = vld [vmem:[#allocation5 + $0xa0] sm:$0xff]  ;;  %v528_v47 = vld [vmem:[#allocation5 + $0xa8] sm:$0xff] }
  0x62   : > { %1526 = vmatprep.subr.bf16.mxu0 %v1525_v12  ;;  %v1549_v45 = vpack.c.bf16 %v526_v44, %v525_v43  ;;  %v1553_v48 = vpack.c.bf16 %v528_v47, %v527_v46  ;;  %v529_v49 = vld [vmem:[#allocation5 + $0xb0] sm:$0xff]  ;;  %v530_v50 = vld [vmem:[#allocation5 + $0xb8] sm:$0xff]  ;;  %v531_v52 = vld [vmem:[#allocation5 + $0xc0] sm:$0xff] }
  0x63   : > { %1546 = vmatprep.subr.bf16.mxu1 %v1545_v42  ;;  %v1557_v51 = vpack.c.bf16 %v530_v50, %v529_v49  ;;  %v532_v53 = vld [vmem:[#allocation5 + $0xc8] sm:$0xff]  ;;  %v533_v55 = vld [vmem:[#allocation5 + $0xd0] sm:$0xff]  ;;  %v534_v56 = vld [vmem:[#allocation5 + $0xd8] sm:$0xff] }
  0x64   : > { %1548 = vmatpush3.bf16.msra.mxu1 %v1545_v42  ;;  %v1561_v54 = vpack.c.bf16 %v532_v53, %v531_v52  ;;  %v1565_v57 = vpack.c.bf16 %v534_v56, %v533_v55  ;;  %v535_v58 = vld [vmem:[#allocation5 + $0xe0] sm:$0xff]  ;;  %v536_v59 = vld [vmem:[#allocation5 + $0xe8] sm:$0xff]  ;;  %v537_v61 = vld [vmem:[#allocation5 + $0xf0] sm:$0xff] }
  0x65   : > { %1528 = vmatpush3.bf16.msra.mxu0 %v1525_v12  ;;  %1550 = vmatprep.subr.bf16.mxu1 %v1549_v45  ;;  %v1569_v60 = vpack.c.bf16 %v536_v59, %v535_v58  ;;  %v538_v62 = vld [vmem:[#allocation5 + $0xf8] sm:$0xff] }
  0x66   : > { %1530 = vmatprep.subr.bf16.mxu0 %v1529_v15  ;;  %v1573_v63 = vpack.c.bf16 %v538_v62, %v537_v61 }
  0x68   : > { %1552 = vmatpush3.bf16.msra.mxu1 %v1549_v45 }
  0x69   : > { %1532 = vmatpush3.bf16.msra.mxu0 %v1529_v15  ;;  %1554 = vmatprep.subr.bf16.mxu1 %v1553_v48 }
  0x6a   : > { %1534 = vmatprep.subr.bf16.mxu0 %v1533_v18 }
  0x6c   : > { %1556 = vmatpush3.bf16.msra.mxu1 %v1553_v48 }
  0x6d   : > { %1536 = vmatpush3.bf16.msra.mxu0 %v1533_v18  ;;  %1558 = vmatprep.subr.bf16.mxu1 %v1557_v51 }
  0x6e   : > { %1538 = vmatprep.subr.bf16.mxu0 %v1537_v21 }
  0x70   : > { %1560 = vmatpush3.bf16.msra.mxu1 %v1557_v51 }
  0x71   : > { %1540 = vmatpush3.bf16.msra.mxu0 %v1537_v21  ;;  %1562 = vmatprep.subr.bf16.mxu1 %v1561_v54 }
  0x72   : > { %1542 = vmatprep.subr.bf16.mxu0 %v1541_v24 }
  0x74   : > { %1564 = vmatpush3.bf16.msra.mxu1 %v1561_v54 }
  0x75   : > { %1544 = vmatpush3.bf16.msra.mxu0 %v1541_v24  ;;  %1566 = vmatprep.subr.bf16.mxu1 %v1565_v57 }
  0x78   : > { %1378 = vmatmul.mubr.f32.vlgmr.msra.gmra.mrb[0].mxu0 %v2015_v25  ;;  %1568 = vmatpush3.bf16.msra.mxu1 %v1565_v57 }
  0x79   : > { %1380 = vmatprep.mubr.f32.mxu0 %v2018_v26  ;;  %1570 = vmatprep.subr.bf16.mxu1 %v1569_v60 }
  0x7c   : > { %1381 = vmatmul.mubr.f32.gmra.mrb[2].mxu0 %v2023_v27  ;;  %1572 = vmatpush3.bf16.msra.mxu1 %v1569_v60 }
  0x7d   : > { %1383 = vmatprep.mubr.f32.mxu0 %v2026_v28  ;;  %1574 = vmatprep.subr.bf16.mxu1 %v1573_v63 }
  0x80   : > { %1384 = vmatmul.mubr.f32.gmra.mrb[4].mxu0 %v2031_v29  ;;  %1576 = vmatpush3.bf16.msra.mxu1 %v1573_v63 }
  0x81   : > { %1386 = vmatprep.mubr.f32.mxu0 %v2034_v30 }
  0x84   : > { %1387 = vmatmul.mubr.f32.gmra.mrb[6].mxu0 %v2039_v31 }
  0x85   : > { %1389 = vmatprep.mubr.f32.mxu0 %v2042_v32 }
  0x88   : > { %1390 = vmatmul.mubr.f32.gmra.mrb[8].mxu0 %v2047_v33 }
  0x89   : > { %1392 = vmatprep.mubr.f32.mxu0 %v2050_v34 }
  0x8c   : > { %1393 = vmatmul.mubr.f32.gmra.mrb[10].mxu0 %v2055_v35 }
  0x8d   : > { %1395 = vmatprep.mubr.f32.mxu0 %v2058_v36 }
  0x90   : > { %1396 = vmatmul.mubr.f32.gmra.mrb[12].mxu0 %v2063_v37 }
  0x91   : > { %1398 = vmatprep.mubr.f32.mxu0 %v2066_v38 }
  0x94   : > { %1399 = vmatmul.mubr.f32.gmra.mrb[14].mxu0 %v2071_v39 }
 0x14b   : > { %v2074_v0 = vpop.f32.mrb[0].mxu0 }
 0x14c   : > { %v403_v1 = vmul.f32 %v2074_v0, %v2074_v0  ;;  %v2078_v2 = vpop.f32.mrb[1].mxu0 }
 0x14d   : > { %v381_v3 = vadd.f32 %v2074_v0, %v2078_v2  ;;  %v402_v4 = vmul.f32 %v2078_v2, %v2078_v2 }
 0x14f   : > { %v418_v5 = vadd.f32 %v403_v1, %v402_v4  ;;  %v2084_v6 = vpop.f32.mrb[2].mxu0 }
 0x150   : > { %v2086_v7 = vpop.f32.mrb[3].mxu0  ;;  %v405_v11 = vmul.f32 %v2084_v6, %v2084_v6 }
 0x151   : > { %v382_v8 = vadd.f32 %v381_v3, %v2086_v7  ;;  %v404_v10 = vmul.f32 %v2086_v7, %v2086_v7 }
 0x153   : > { %v419_v12 = vadd.f32 %v418_v5, %v404_v10  ;;  %v2093_v13 = vpop.f32.mrb[4].mxu0  ;;  %v383_v14 = vadd.f32 %v2084_v6, %v382_v8 }
 0x154   : > { %v2096_v15 = vpop.f32.mrb[5].mxu0  ;;  %v407_v19 = vmul.f32 %v2093_v13, %v2093_v13 }
 0x155   : > { %v384_v16 = vadd.f32 %v383_v14, %v2096_v15  ;;  %v406_v17 = vmul.f32 %v2096_v15, %v2096_v15  ;;  %v420_v18 = vadd.f32 %v419_v12, %v405_v11 }
 0x157   : > { %v421_v20 = vadd.f32 %v420_v18, %v406_v17  ;;  %v2103_v21 = vpop.f32.mrb[6].mxu0  ;;  %v385_v22 = vadd.f32 %v2093_v13, %v384_v16 }
 0x158   : > { %v2106_v23 = vpop.f32.mrb[7].mxu0  ;;  %v409_v42 = vmul.f32 %v2103_v21, %v2103_v21 }
 0x159   : > { %v386_v24 = vadd.f32 %v385_v22, %v2106_v23  ;;  %v408_v40 = vmul.f32 %v2106_v23, %v2106_v23  ;;  %v422_v41 = vadd.f32 %v421_v20, %v407_v19 }
 0x15b   : > { %v423_v43 = vadd.f32 %v422_v41, %v408_v40  ;;  %v2113_v44 = vpop.f32.mrb[8].mxu0  ;;  %v387_v45 = vadd.f32 %v2103_v21, %v386_v24 }
 0x15c   : > { %v2116_v46 = vpop.f32.mrb[9].mxu0  ;;  %v411_v50 = vmul.f32 %v2113_v44, %v2113_v44 }
 0x15d   : > { %v388_v47 = vadd.f32 %v387_v45, %v2116_v46  ;;  %v410_v48 = vmul.f32 %v2116_v46, %v2116_v46  ;;  %v424_v49 = vadd.f32 %v423_v43, %v409_v42 }
 0x15f   : > { %v425_v51 = vadd.f32 %v424_v49, %v410_v48  ;;  %v2123_v52 = vpop.f32.mrb[10].mxu0  ;;  %v389_v53 = vadd.f32 %v2113_v44, %v388_v47 }
 0x160   : > { %v2126_v54 = vpop.f32.mrb[11].mxu0  ;;  %v413_v58 = vmul.f32 %v2123_v52, %v2123_v52 }
 0x161   : > { %v390_v55 = vadd.f32 %v389_v53, %v2126_v54  ;;  %v412_v56 = vmul.f32 %v2126_v54, %v2126_v54  ;;  %v426_v57 = vadd.f32 %v425_v51, %v411_v50 }
 0x163   : > { %v427_v59 = vadd.f32 %v426_v57, %v412_v56  ;;  %v2133_v60 = vpop.f32.mrb[12].mxu0  ;;  %v391_v61 = vadd.f32 %v2123_v52, %v390_v55 }
 0x164   : > { %v362_v62 = vpop.f32.mrb[13].mxu0  ;;  %v415_v4 = vmul.f32 %v2133_v60, %v2133_v60 }
 0x165   : > { %v392_v63 = vadd.f32 %v391_v61, %v362_v62  ;;  %v414_v1 = vmul.f32 %v362_v62, %v362_v62  ;;  %v428_v3 = vadd.f32 %v427_v59, %v413_v58  ;;  %v450_v59 = vlaneseq }
 0x167   : > { %v429_v5 = vadd.f32 %v428_v3, %v414_v1  ;;  %v2138_v8 = vpop.f32.mrb[14].mxu0  ;;  %v393_v10 = vadd.f32 %v2133_v60, %v392_v63  ;;  %v451_v61 = vshrl.u32 %v450_v59, 7  ;;  %v443_v63 = vld [vmem:[%s2487_s2] sm:$0x1] }
 0x168   : > { %v372_v11 = vpop.f32.mrb[15].mxu0  ;;  %v417_v17 = vmul.f32 %v2138_v8, %v2138_v8 }
 0x169   : > { %v394_v12 = vadd.f32 %v393_v10, %v372_v11  ;;  %v416_v14 = vmul.f32 %v372_v11, %v372_v11  ;;  %v430_v16 = vadd.f32 %v429_v5, %v415_v4  ;;  %v2147_v1 = vsub.s32 0, %v451_v61  ;;  %v444_v5 = vld [vmem:[%s2487_s2 + $0x1] sm:$0x1] }
 0x16b   : > { %v395_v18 = vadd.f32 %v2138_v8, %v394_v12  ;;  %v431_v19 = vadd.f32 %v430_v16, %v416_v14 }
 0x16d   : > { %v396_v20 = vrot.slane %v395_v18, 4  ;;  %v432_v22 = vadd.f32 %v431_v19, %v417_v17 }
 0x16f   : > { %v397_v24 = vadd.f32 %v396_v20, %v395_v18  ;;  %v433_v40 = vrot.slane %v432_v22, 4 }
 0x171   : > { %v398_v41 = vrot.slane %v397_v24, 2  ;;  %v434_v42 = vadd.f32 %v433_v40, %v432_v22 }
 0x173   : > { %v399_v43 = vadd.f32 %v398_v41, %v397_v24  ;;  %v435_v45 = vrot.slane %v434_v42, 2 }
 0x175   : > { %v400_v47 = vrot.slane %v399_v43, 1  ;;  %v436_v48 = vadd.f32 %v435_v45, %v434_v42 }
 0x177   : > { %v401_v49 = vadd.f32 %v400_v47, %v399_v43  ;;  %v437_v50 = vrot.slane %v436_v48, 1 }
 0x179   : > { %v438_v51 = vadd.f32 %v437_v50, %v436_v48  ;;  %v439_v53 = vmul.f32 0.0078125, %v401_v49 }
 0x17b   : > { %v440_v55 = vmul.f32 0.0078125, %v438_v51  ;;  %v441_v56 = vmul.f32 %v439_v53, %v439_v53 }
 0x17d   : > { %v442_v57 = vsub.f32 %v440_v55, %v441_v56 }
 0x17f   : > { %v445_v58 = vadd.f32 1e-05, %v442_v57 }
 0x181   : > { %1686 = vrsqrt.f32 %v445_v58 }
 0x18b   : > { %v1687_v3 = vpop.eup %1686 }
 0x18c   : > { %v447_v4 = vmul.f32 %v1687_v3, %v443_v63 }
 0x18e   : > { %v448_v10 = vmul.f32 %v447_v4, %v439_v53  ;;  %v453_v12 = vrot.slane %v447_v4, %v2147_v1 }
 0x190   : > { %v449_v14 = vsub.f32 %v444_v5, %v448_v10  ;;  %v468_v16 = vmul.f32 %v453_v12, %v372_v11  ;;  %v454_v17 = vmul.f32 %v453_v12, %v2078_v2  ;;  %v455_v18 = vmul.f32 %v2074_v0, %v453_v12 }
 0x191   : > { %v456_v19 = vmul.f32 %v453_v12, %v2086_v7  ;;  %v457_v20 = vmul.f32 %v2084_v6, %v453_v12  ;;  %v458_v22 = vmul.f32 %v453_v12, %v2096_v15  ;;  %v459_v24 = vmul.f32 %v2093_v13, %v453_v12 }
 0x192   : > { %v473_v40 = vrot.slane %v449_v14, %v2147_v1  ;;  %v460_v41 = vmul.f32 %v453_v12, %v2106_v23  ;;  %v461_v42 = vmul.f32 %v2103_v21, %v453_v12  ;;  %v462_v11 = vmul.f32 %v453_v12, %v2116_v46 }
 0x193   : > { %v463_v2 = vmul.f32 %v2113_v44, %v453_v12  ;;  %v464_v0 = vmul.f32 %v453_v12, %v2126_v54  ;;  %v465_v7 = vmul.f32 %v2123_v52, %v453_v12  ;;  %v466_v43 = vmul.f32 %v453_v12, %v362_v62 }
 0x194   : > { %v488_v6 = vadd.f32 %v473_v40, %v468_v16  ;;  %v474_v45 = vadd.f32 %v473_v40, %v454_v17  ;;  %v475_v15 = vadd.f32 %v473_v40, %v455_v18  ;;  %v476_v47 = vadd.f32 %v473_v40, %v456_v19 }
 0x195   : > { %v477_v13 = vadd.f32 %v473_v40, %v457_v20  ;;  %v478_v48 = vadd.f32 %v473_v40, %v458_v22  ;;  %v479_v49 = vadd.f32 %v473_v40, %v459_v24  ;;  %v480_v50 = vadd.f32 %v473_v40, %v460_v41  ;;  %v828_v24 = vld [vmem:[#allocation5 + $0x108] sm:$0xff]  ;;  %v830_v41 = vld [vmem:[#allocation5 + $0x118] sm:$0xff] }
 0x196   : > { %v490_v23 = vmax.f32 %v474_v45, 0.0  ;;  %v491_v51 = vmax.f32 %v475_v15, 0.0  ;;  %v492_v21 = vmax.f32 %v476_v47, 0.0  ;;  %v481_v53 = vadd.f32 %v473_v40, %v461_v42  ;;  %v831_v42 = vld [vmem:[#allocation5 + $0x120] sm:$0xff]  ;;  %v837_v45 = vld [vmem:[#allocation5 + $0x150] sm:$0xff]  ;;  %v838_v47 = vld [vmem:[#allocation5 + $0x158] sm:$0xff] }
 0x197   : > { %v493_v52 = vmax.f32 %v477_v13, 0.0  ;;  %v494_v54 = vmax.f32 %v478_v48, 0.0  ;;  %v482_v55 = vadd.f32 %v473_v40, %v462_v11  ;;  %v483_v56 = vadd.f32 %v473_v40, %v463_v2  ;;  %v832_v11 = vld [vmem:[#allocation5 + $0x128] sm:$0xff]  ;;  %v833_v2 = vld [vmem:[#allocation5 + $0x130] sm:$0xff]  ;;  %v839_v48 = vld [vmem:[#allocation5 + $0x160] sm:$0xff] }
 0x198   : > { %v2167_v46 = vadd.f32 %v490_v23, %v2011_v9  ;;  %v2170_v44 = vadd.f32 %v491_v51, %v2015_v25  ;;  %v2174_v62 = vadd.f32 %v492_v21, %v2018_v26  ;;  %v484_v57 = vadd.f32 %v473_v40, %v464_v0  ;;  %v834_v0 = vld [vmem:[#allocation5 + $0x138] sm:$0xff]  ;;  %v841_v23 = vld [vmem:[#allocation5 + $0x170] sm:$0xff] }
 0x199   : > { %v485_v58 = vadd.f32 %v473_v40, %v465_v7  ;;  %v486_v59 = vadd.f32 %v473_v40, %v466_v43  ;;  %v467_v9 = vmul.f32 %v2133_v60, %v453_v12  ;;  %v469_v25 = vmul.f32 %v2138_v8, %v453_v12  ;;  %v835_v43 = vld [vmem:[#allocation5 + $0x140] sm:$0xff]  ;;  %v842_v51 = vld [vmem:[#allocation5 + $0x178] sm:$0xff] }
 0x19a   : > { %1433 = vmatprep.mubr.f32.mxu1 %v2167_v46  ;;  %v2181_v61 = vadd.f32 %v493_v52, %v2023_v27  ;;  %v495_v63 = vmax.f32 %v479_v49, 0.0  ;;  %v2184_v26 = vadd.f32 %v494_v54, %v2026_v28  ;;  %v496_v4 = vmax.f32 %v480_v50, 0.0  ;;  %v840_v49 = vld [vmem:[#allocation5 + $0x168] sm:$0xff] }
 0x19b   : > { %1434 = vmatmul.mubr.f32.vlgmr.msra.gmra.mrb[0].mxu1 %v2170_v44  ;;  %v487_v3 = vadd.f32 %v473_v40, %v467_v9  ;;  %v489_v5 = vadd.f32 %v473_v40, %v469_v25  ;;  %v497_v10 = vmax.f32 %v481_v53, 0.0  ;;  %v498_v27 = vmax.f32 %v482_v55, 0.0 }
 0x19c   : > { %1436 = vmatprep.mubr.f32.mxu1 %v2174_v62  ;;  %v2189_v60 = vadd.f32 %v495_v63, %v2031_v29  ;;  %v2192_v8 = vadd.f32 %v496_v4, %v2034_v30  ;;  %v499_v12 = vmax.f32 %v483_v56, 0.0  ;;  %v500_v16 = vmax.f32 %v484_v57, 0.0 }
 0x19d   : > { %v2197_v28 = vadd.f32 %v497_v10, %v2039_v31  ;;  %v2200_v14 = vadd.f32 %v498_v27, %v2042_v32  ;;  %v501_v30 = vmax.f32 %v485_v58, 0.0  ;;  %v502_v18 = vmax.f32 %v486_v59, 0.0 }
 0x19e   : > { %v2205_v29 = vadd.f32 %v499_v12, %v2047_v33  ;;  %v2208_v17 = vadd.f32 %v500_v16, %v2050_v34  ;;  %v503_v32 = vmax.f32 %v487_v3, 0.0  ;;  %v504_v20 = vmax.f32 %v488_v6, 0.0  ;;  %v836_v6 = vld [vmem:[#allocation5 + $0x148] sm:$0xff] }
 0x19f   : > { %1437 = vmatmul.mubr.f32.gmra.mrb[2].mxu1 %v2181_v61  ;;  %v2213_v31 = vadd.f32 %v501_v30, %v2055_v35  ;;  %v2216_v19 = vadd.f32 %v502_v18, %v2058_v36  ;;  %v505_v34 = vmax.f32 %v489_v5, 0.0  ;;  %v827_v36 = vld [vmem:[#allocation5 + $0x100] sm:$0xff]  ;;  %v1589_v7 = vpack.c.bf16 %v834_v0, %v833_v2 }
 0x1a0   : > { %1439 = vmatprep.mubr.f32.mxu1 %v2184_v26  ;;  %v2221_v33 = vadd.f32 %v503_v32, %v2063_v37  ;;  %v2224_v22 = vadd.f32 %v504_v20, %v2066_v38  ;;  %v1577_v40 = vpack.c.bf16 %v828_v24, %v827_v36  ;;  %v829_v37 = vld [vmem:[#allocation5 + $0x110] sm:$0xff]  ;;  %v1593_v15 = vpack.c.bf16 %v836_v6, %v835_v43 }
 0x1a1   : > { %v2229_v35 = vadd.f32 %v505_v34, %v2071_v39  ;;  %v1581_v38 = vpack.c.bf16 %v830_v41, %v829_v37  ;;  %v1585_v39 = vpack.c.bf16 %v832_v11, %v831_v42  ;;  %v1597_v13 = vpack.c.bf16 %v838_v47, %v837_v45 }
 0x1a2   : > { %1578 = vmatprep.subr.bf16.mxu0 %v1577_v40  ;;  %1609 = vmatprep.subr.bf16.mxu1 %v1577_v40  ;;  %v1601_v50 = vpack.c.bf16 %v840_v49, %v839_v48  ;;  %v1605_v21 = vpack.c.bf16 %v842_v51, %v841_v23 }
 0x1a3   : > { %1440 = vmatmul.mubr.f32.gmra.mrb[4].mxu1 %v2189_v60  ;;  %1580 = vmatpush3.bf16.msra.mxu0 %v1577_v40 }
 0x1a4   : > { %1442 = vmatprep.mubr.f32.mxu1 %v2192_v8  ;;  %1617 = vmatpush3.bf16.msra.mxu1 %v1577_v40 }
 0x1a5   : > { %1582 = vmatprep.subr.bf16.mxu0 %v1581_v38  ;;  %1610 = vmatprep.subr.bf16.mxu1 %v1581_v38 }
 0x1a7   : > { %1443 = vmatmul.mubr.f32.gmra.mrb[6].mxu1 %v2197_v28  ;;  %1584 = vmatpush3.bf16.msra.mxu0 %v1581_v38 }
 0x1a8   : > { %1445 = vmatprep.mubr.f32.mxu1 %v2200_v14  ;;  %1618 = vmatpush3.bf16.msra.mxu1 %v1581_v38 }
 0x1a9   : > { %1586 = vmatprep.subr.bf16.mxu0 %v1585_v39  ;;  %1611 = vmatprep.subr.bf16.mxu1 %v1585_v39 }
 0x1ab   : > { %1446 = vmatmul.mubr.f32.gmra.mrb[8].mxu1 %v2205_v29  ;;  %1588 = vmatpush3.bf16.msra.mxu0 %v1585_v39 }
 0x1ac   : > { %1448 = vmatprep.mubr.f32.mxu1 %v2208_v17  ;;  %1619 = vmatpush3.bf16.msra.mxu1 %v1585_v39 }
 0x1ad   : > { %1590 = vmatprep.subr.bf16.mxu0 %v1589_v7  ;;  %1612 = vmatprep.subr.bf16.mxu1 %v1589_v7 }
 0x1af   : > { %1449 = vmatmul.mubr.f32.gmra.mrb[10].mxu1 %v2213_v31  ;;  %1592 = vmatpush3.bf16.msra.mxu0 %v1589_v7 }
 0x1b0   : > { %1451 = vmatprep.mubr.f32.mxu1 %v2216_v19  ;;  %1620 = vmatpush3.bf16.msra.mxu1 %v1589_v7 }
 0x1b1   : > { %1594 = vmatprep.subr.bf16.mxu0 %v1593_v15  ;;  %1613 = vmatprep.subr.bf16.mxu1 %v1593_v15 }
 0x1b3   : > { %1452 = vmatmul.mubr.f32.gmra.mrb[12].mxu1 %v2221_v33  ;;  %1596 = vmatpush3.bf16.msra.mxu0 %v1593_v15 }
 0x1b4   : > { %1454 = vmatprep.mubr.f32.mxu1 %v2224_v22  ;;  %1621 = vmatpush3.bf16.msra.mxu1 %v1593_v15 }
 0x1b5   : > { %1598 = vmatprep.subr.bf16.mxu0 %v1597_v13  ;;  %1614 = vmatprep.subr.bf16.mxu1 %v1597_v13 }
 0x1b7   : > { %1455 = vmatmul.mubr.f32.gmra.mrb[14].mxu1 %v2229_v35  ;;  %1600 = vmatpush3.bf16.msra.mxu0 %v1597_v13 }
 0x1b8   : > { %1622 = vmatpush3.bf16.msra.mxu1 %v1597_v13  ;;  %1602 = vmatprep.subr.bf16.mxu0 %v1601_v50 }
 0x1b9   : > { %1615 = vmatprep.subr.bf16.mxu1 %v1601_v50 }
 0x1bb   : > { %1604 = vmatpush3.bf16.msra.mxu0 %v1601_v50 }
 0x1bc   : > { %1623 = vmatpush3.bf16.msra.mxu1 %v1601_v50  ;;  %1606 = vmatprep.subr.bf16.mxu0 %v1605_v21 }
 0x1bd   : > { %1616 = vmatprep.subr.bf16.mxu1 %v1605_v21 }
 0x1bf   : > { %1608 = vmatpush3.bf16.msra.mxu0 %v1605_v21 }
 0x1c0   : > { %1624 = vmatpush3.bf16.msra.mxu1 %v1605_v21 }
 0x26e   : > { %v2232_v53 = vpop.f32.mrb[0].mxu1 }
 0x26f   : > { %v706_v52 = vmul.f32 %v2232_v53, %v2232_v53  ;;  %v2236_v54 = vpop.f32.mrb[1].mxu1 }
 0x270   : > { %v684_v55 = vadd.f32 %v2232_v53, %v2236_v54  ;;  %v705_v56 = vmul.f32 %v2236_v54, %v2236_v54 }
 0x272   : > { %v721_v57 = vadd.f32 %v706_v52, %v705_v56  ;;  %v2242_v58 = vpop.f32.mrb[2].mxu1 }
 0x273   : > { %v2244_v59 = vpop.f32.mrb[3].mxu1  ;;  %v708_v63 = vmul.f32 %v2242_v58, %v2242_v58 }
 0x274   : > { %v685_v9 = vadd.f32 %v684_v55, %v2244_v59  ;;  %v707_v25 = vmul.f32 %v2244_v59, %v2244_v59 }
 0x276   : > { %v722_v3 = vadd.f32 %v721_v57, %v707_v25  ;;  %v2251_v4 = vpop.f32.mrb[4].mxu1  ;;  %v686_v5 = vadd.f32 %v2242_v58, %v685_v9 }
 0x277   : > { %v2254_v10 = vpop.f32.mrb[5].mxu1  ;;  %v710_v30 = vmul.f32 %v2251_v4, %v2251_v4 }
 0x278   : > { %v687_v27 = vadd.f32 %v686_v5, %v2254_v10  ;;  %v709_v12 = vmul.f32 %v2254_v10, %v2254_v10  ;;  %v723_v16 = vadd.f32 %v722_v3, %v708_v63 }
 0x27a   : > { %v724_v18 = vadd.f32 %v723_v16, %v709_v12  ;;  %v2261_v32 = vpop.f32.mrb[6].mxu1  ;;  %v688_v20 = vadd.f32 %v2251_v4, %v687_v27 }
 0x27b   : > { %v2264_v34 = vpop.f32.mrb[7].mxu1  ;;  %v712_v37 = vmul.f32 %v2261_v32, %v2261_v32 }
 0x27c   : > { %v689_v36 = vadd.f32 %v688_v20, %v2264_v34  ;;  %v711_v24 = vmul.f32 %v2264_v34, %v2264_v34  ;;  %v725_v40 = vadd.f32 %v724_v18, %v710_v30 }
 0x27e   : > { %v726_v41 = vadd.f32 %v725_v40, %v711_v24  ;;  %v2271_v38 = vpop.f32.mrb[8].mxu1  ;;  %v690_v42 = vadd.f32 %v2261_v32, %v689_v36 }
 0x27f   : > { %v645_v11 = vpop.f32.mrb[9].mxu1  ;;  %v714_v7 = vmul.f32 %v2271_v38, %v2271_v38 }
 0x280   : > { %v691_v39 = vadd.f32 %v690_v42, %v645_v11  ;;  %v713_v2 = vmul.f32 %v645_v11, %v645_v11  ;;  %v727_v0 = vadd.f32 %v726_v41, %v712_v37 }
 0x282   : > { %v728_v43 = vadd.f32 %v727_v0, %v713_v2  ;;  %v1450_v6 = vpop.f32.mrb[10].mxu1  ;;  %v692_v45 = vadd.f32 %v2271_v38, %v691_v39 }
 0x283   : > { %v655_v15 = vpop.f32.mrb[11].mxu1  ;;  %v716_v49 = vmul.f32 %v1450_v6, %v1450_v6 }
 0x284   : > { %v693_v47 = vadd.f32 %v692_v45, %v655_v15  ;;  %v715_v13 = vmul.f32 %v655_v15, %v655_v15  ;;  %v729_v48 = vadd.f32 %v728_v43, %v714_v7 }
 0x286   : > { %v730_v50 = vadd.f32 %v729_v48, %v715_v13  ;;  %v1453_v23 = vpop.f32.mrb[12].mxu1  ;;  %v694_v51 = vadd.f32 %v1450_v6, %v693_v47 }
 0x287   : > { %v665_v21 = vpop.f32.mrb[13].mxu1  ;;  %v718_v57 = vmul.f32 %v1453_v23, %v1453_v23 }
 0x288   : > { %v695_v52 = vadd.f32 %v694_v51, %v665_v21  ;;  %v717_v55 = vmul.f32 %v665_v21, %v665_v21  ;;  %v731_v56 = vadd.f32 %v730_v50, %v716_v49  ;;  %v1238_v51 = vld [vmem:[%s2487_s2 + $0x2] sm:$0x1] }
 0x28a   : > { %v732_v9 = vadd.f32 %v731_v56, %v717_v55  ;;  %v2277_v25 = vpop.f32.mrb[14].mxu1  ;;  %v696_v63 = vadd.f32 %v1453_v23, %v695_v52  ;;  %v1239_v56 = vld [vmem:[%s2487_s2 + $0x3] sm:$0x1] }
 0x28b   : > { %v675_v3 = vpop.f32.mrb[15].mxu1  ;;  %v720_v16 = vmul.f32 %v2277_v25, %v2277_v25 }
 0x28c   : > { %v697_v5 = vadd.f32 %v696_v63, %v675_v3  ;;  %v719_v27 = vmul.f32 %v675_v3, %v675_v3  ;;  %v733_v12 = vadd.f32 %v732_v9, %v718_v57 }
 0x28e   : > { %v698_v30 = vadd.f32 %v2277_v25, %v697_v5  ;;  %v734_v18 = vadd.f32 %v733_v12, %v719_v27 }
 0x290   : > { %v699_v20 = vrot.slane %v698_v30, 4  ;;  %v735_v36 = vadd.f32 %v734_v18, %v720_v16 }
 0x292   : > { %v700_v24 = vadd.f32 %v699_v20, %v698_v30  ;;  %v736_v40 = vrot.slane %v735_v36, 4 }
 0x294   : > { %v701_v37 = vrot.slane %v700_v24, 2  ;;  %v737_v41 = vadd.f32 %v736_v40, %v735_v36 }
 0x296   : > { %v702_v42 = vadd.f32 %v701_v37, %v700_v24  ;;  %v738_v39 = vrot.slane %v737_v41, 2 }
 0x298   : > { %v703_v2 = vrot.slane %v702_v42, 1  ;;  %v739_v0 = vadd.f32 %v738_v39, %v737_v41 }
 0x29a   : > { %v704_v7 = vadd.f32 %v703_v2, %v702_v42  ;;  %v740_v43 = vrot.slane %v739_v0, 1 }
 0x29c   : > { %v741_v45 = vadd.f32 %v740_v43, %v739_v0  ;;  %v742_v47 = vmul.f32 0.0078125, %v704_v7 }
 0x29e   : > { %v743_v13 = vmul.f32 0.0078125, %v741_v45  ;;  %v744_v48 = vmul.f32 %v742_v47, %v742_v47 }
 0x2a0   : > { %v745_v49 = vsub.f32 %v743_v13, %v744_v48 }
 0x2a2   : > { %v749_v50 = vadd.f32 1e-05, %v745_v49 }
 0x2a4   : > { %1688 = vrsqrt.f32 %v749_v50 }
 0x2ae   : > { %v1689_v52 = vpop.eup %1688 }
 0x2af   : > { %v751_v55 = vmul.f32 %v1689_v52, %v1238_v51 }
 0x2b1   : > { %v752_v57 = vmul.f32 %v751_v55, %v742_v47  ;;  %v757_v9 = vrot.slane %v751_v55, %v2147_v1 }
 0x2b3   : > { %v753_v63 = vsub.f32 %v1239_v56, %v752_v57  ;;  %v772_v5 = vmul.f32 %v757_v9, %v675_v3  ;;  %v758_v27 = vmul.f32 %v757_v9, %v2236_v54  ;;  %v766_v12 = vmul.f32 %v757_v9, %v645_v11 }
 0x2b4   : > { %v759_v16 = vmul.f32 %v2232_v53, %v757_v9  ;;  %v767_v30 = vmul.f32 %v2271_v38, %v757_v9  ;;  %v760_v18 = vmul.f32 %v757_v9, %v2244_v59  ;;  %v768_v20 = vmul.f32 %v757_v9, %v655_v15 }
 0x2b5   : > { %v777_v36 = vrot.slane %v753_v63, %v2147_v1  ;;  %v761_v24 = vmul.f32 %v2242_v58, %v757_v9  ;;  %v769_v40 = vmul.f32 %v1450_v6, %v757_v9  ;;  %v762_v37 = vmul.f32 %v757_v9, %v2254_v10 }
 0x2b6   : > { %v770_v41 = vmul.f32 %v757_v9, %v665_v21  ;;  %v763_v3 = vmul.f32 %v2251_v4, %v757_v9  ;;  %v771_v42 = vmul.f32 %v1453_v23, %v757_v9  ;;  %v764_v54 = vmul.f32 %v757_v9, %v2264_v34 }
 0x2b7   : > { %v792_v11 = vadd.f32 %v777_v36, %v772_v5  ;;  %v778_v53 = vadd.f32 %v777_v36, %v758_v27  ;;  %v786_v39 = vadd.f32 %v777_v36, %v766_v12  ;;  %v779_v38 = vadd.f32 %v777_v36, %v759_v16 }
 0x2b8   : > { %v787_v2 = vadd.f32 %v777_v36, %v767_v30  ;;  %v780_v59 = vadd.f32 %v777_v36, %v760_v18  ;;  %v788_v15 = vadd.f32 %v777_v36, %v768_v20  ;;  %v781_v0 = vadd.f32 %v777_v36, %v761_v24 }
 0x2b9   : > { %v794_v7 = vmax.f32 %v778_v53, 0.0  ;;  %v802_v43 = vmax.f32 %v786_v39, 0.0  ;;  %v795_v58 = vmax.f32 %v779_v38, 0.0  ;;  %v789_v6 = vadd.f32 %v777_v36, %v769_v40 }
 0x2ba   : > { %v803_v45 = vmax.f32 %v787_v2, 0.0  ;;  %v796_v10 = vmax.f32 %v780_v59, 0.0  ;;  %v804_v21 = vmax.f32 %v788_v15, 0.0  ;;  %v797_v47 = vmax.f32 %v781_v0, 0.0 }
 0x2bb   : > { %v810_v4 = vadd.f32 %v794_v7, %v2167_v46  ;;  %v818_v34 = vadd.f32 %v802_v43, %v2200_v14  ;;  %v811_v23 = vadd.f32 %v795_v58, %v2170_v44  ;;  %v805_v13 = vmax.f32 %v789_v6, 0.0 }
 0x2bc   : > { %v819_v48 = vadd.f32 %v803_v45, %v2205_v29  ;;  %v812_v49 = vadd.f32 %v796_v10, %v2174_v62  ;;  %v820_v50 = vadd.f32 %v804_v21, %v2208_v17  ;;  %v813_v51 = vadd.f32 %v797_v47, %v2181_v61 }
 0x2bd   : > { %1489 = vmatprep.mubr.f32.mxu0 %v810_v4  ;;  %1501 = vmatprep.mubr.f32.mxu1 %v818_v34  ;;  %v782_v52 = vadd.f32 %v777_v36, %v762_v37  ;;  %v790_v55 = vadd.f32 %v777_v36, %v770_v41  ;;  %v783_v46 = vadd.f32 %v777_v36, %v763_v3  ;;  %v808_v5 = vmax.f32 %v792_v11, 0.0 }
 0x2be   : > { %1490 = vmatmul.mubr.f32.vlgmr.msra.gmra.mrb[16].mxu0 %v811_v23  ;;  %1502 = vmatmul.mubr.f32.vlgmr.msra.gmra.mrb[16].mxu1 %v819_v48  ;;  %v791_v56 = vadd.f32 %v777_v36, %v771_v42  ;;  %v784_v14 = vadd.f32 %v777_v36, %v764_v54  ;;  %v821_v44 = vadd.f32 %v805_v13, %v2213_v31 }
 0x2bf   : > { %1492 = vmatprep.mubr.f32.mxu0 %v812_v49  ;;  %1504 = vmatprep.mubr.f32.mxu1 %v820_v50  ;;  %v798_v29 = vmax.f32 %v782_v52, 0.0  ;;  %v806_v57 = vmax.f32 %v790_v55, 0.0  ;;  %v765_v62 = vmul.f32 %v2261_v32, %v757_v9  ;;  %v799_v17 = vmax.f32 %v783_v46, 0.0 }
 0x2c0   : > { %v807_v63 = vmax.f32 %v791_v56, 0.0  ;;  %v773_v61 = vmul.f32 %v2277_v25, %v757_v9  ;;  %v800_v16 = vmax.f32 %v784_v14, 0.0  ;;  %v824_v25 = vadd.f32 %v808_v5, %v2224_v22 }
 0x2c1   : > { %v814_v27 = vadd.f32 %v798_v29, %v2184_v26  ;;  %v822_v12 = vadd.f32 %v806_v57, %v2216_v19  ;;  %v785_v30 = vadd.f32 %v777_v36, %v765_v62  ;;  %v815_v18 = vadd.f32 %v799_v17, %v2189_v60 }
 0x2c2   : > { %1493 = vmatmul.mubr.f32.gmra.mrb[18].mxu0 %v813_v51  ;;  %1505 = vmatmul.mubr.f32.gmra.mrb[18].mxu1 %v821_v44  ;;  %v793_v31 = vadd.f32 %v777_v36, %v773_v61  ;;  %v823_v32 = vadd.f32 %v807_v63, %v2221_v33  ;;  %v816_v24 = vadd.f32 %v800_v16, %v2192_v8 }
 0x2c3   : > { %1495 = vmatprep.mubr.f32.mxu0 %v814_v27  ;;  %1507 = vmatprep.mubr.f32.mxu1 %v822_v12  ;;  %v801_v20 = vmax.f32 %v785_v30, 0.0 }
 0x2c4   : > { %v809_v9 = vmax.f32 %v793_v31, 0.0 }
 0x2c5   : > { %v817_v26 = vadd.f32 %v801_v20, %v2197_v28 }
 0x2c6   : > { %1496 = vmatmul.mubr.f32.gmra.mrb[20].mxu0 %v815_v18  ;;  %1508 = vmatmul.mubr.f32.gmra.mrb[20].mxu1 %v823_v32  ;;  %v825_v19 = vadd.f32 %v809_v9, %v2229_v35 }
 0x2c7   : > { %1498 = vmatprep.mubr.f32.mxu0 %v816_v24  ;;  %1510 = vmatprep.mubr.f32.mxu1 %v824_v25 }
 0x2ca   : > { %1499 = vmatmul.mubr.f32.gmra.mrb[22].mxu0 %v817_v26  ;;  %1511 = vmatmul.mubr.f32.gmra.mrb[22].mxu1 %v825_v19 }
 0x391   : > { %v2316_v36 = vpop.f32.mrb[16].mxu0  ;;  %v2318_v60 = vpop.f32.mrb[16].mxu1 }
 0x392   : > { %v1010_v8 = vmul.f32 %v2316_v36, %v2316_v36  ;;  %v2322_v33 = vpop.f32.mrb[17].mxu0  ;;  %v2324_v22 = vpop.f32.mrb[17].mxu1  ;;  %v1018_v56 = vmul.f32 %v2318_v60, %v2318_v60 }
 0x393   : > { %v988_v40 = vadd.f32 %v2316_v36, %v2322_v33  ;;  %v1009_v28 = vmul.f32 %v2322_v33, %v2322_v33  ;;  %v1017_v52 = vmul.f32 %v2324_v22, %v2324_v22 }
 0x395   : > { %v1025_v35 = vadd.f32 %v1010_v8, %v1009_v28  ;;  %v2330_v37 = vpop.f32.mrb[18].mxu0  ;;  %v2332_v41 = vpop.f32.mrb[18].mxu1 }
 0x396   : > { %v2334_v3 = vpop.f32.mrb[19].mxu0  ;;  %v2336_v42 = vpop.f32.mrb[19].mxu1  ;;  %v1012_v53 = vmul.f32 %v2330_v37, %v2330_v37  ;;  %v1020_v17 = vmul.f32 %v2332_v41, %v2332_v41 }
 0x397   : > { %v989_v54 = vadd.f32 %v988_v40, %v2334_v3  ;;  %v1011_v11 = vmul.f32 %v2334_v3, %v2334_v3  ;;  %v1019_v29 = vmul.f32 %v2336_v42, %v2336_v42 }
 0x399   : > { %v1026_v39 = vadd.f32 %v1025_v35, %v1011_v11  ;;  %v2343_v38 = vpop.f32.mrb[20].mxu0  ;;  %v2345_v2 = vpop.f32.mrb[20].mxu1  ;;  %v990_v59 = vadd.f32 %v2330_v37, %v989_v54 }
 0x39a   : > { %v2348_v15 = vpop.f32.mrb[21].mxu0  ;;  %v2350_v0 = vpop.f32.mrb[21].mxu1  ;;  %v1014_v6 = vmul.f32 %v2343_v38, %v2343_v38  ;;  %v1022_v16 = vmul.f32 %v2345_v2, %v2345_v2 }
 0x39b   : > { %v991_v7 = vadd.f32 %v990_v59, %v2348_v15  ;;  %v1013_v43 = vmul.f32 %v2348_v15, %v2348_v15  ;;  %v1027_v58 = vadd.f32 %v1026_v39, %v1012_v53  ;;  %v1021_v61 = vmul.f32 %v2350_v0, %v2350_v0 }
 0x39d   : > { %v1028_v45 = vadd.f32 %v1027_v58, %v1013_v43  ;;  %v2357_v10 = vpop.f32.mrb[22].mxu0  ;;  %v2359_v21 = vpop.f32.mrb[22].mxu1  ;;  %v992_v47 = vadd.f32 %v2343_v38, %v991_v7 }
 0x39e   : > { %v2362_v4 = vpop.f32.mrb[23].mxu0  ;;  %v979_v34 = vpop.f32.mrb[23].mxu1  ;;  %v1016_v49 = vmul.f32 %v2357_v10, %v2357_v10  ;;  %v1024_v24 = vmul.f32 %v2359_v21, %v2359_v21 }
 0x39f   : > { %v993_v23 = vadd.f32 %v992_v47, %v2362_v4  ;;  %v1015_v13 = vmul.f32 %v2362_v4, %v2362_v4  ;;  %v1029_v48 = vadd.f32 %v1028_v45, %v1014_v6  ;;  %v1023_v32 = vmul.f32 %v979_v34, %v979_v34 }
 0x3a1   : > { %v994_v50 = vadd.f32 %v2357_v10, %v993_v23  ;;  %v1030_v51 = vadd.f32 %v1029_v48, %v1015_v13  ;;  %v1240_v13 = vld [vmem:[%s2487_s2 + $0x4] sm:$0x1] }
 0x3a3   : > { %v995_v55 = vadd.f32 %v994_v50, %v2324_v22  ;;  %v1031_v46 = vadd.f32 %v1030_v51, %v1016_v49  ;;  %v1241_v50 = vld [vmem:[%s2487_s2 + $0x5] sm:$0x1] }
 0x3a5   : > { %v996_v14 = vadd.f32 %v2318_v60, %v995_v55  ;;  %v1032_v44 = vadd.f32 %v1031_v46, %v1017_v52 }
 0x3a7   : > { %v1033_v57 = vadd.f32 %v1032_v44, %v1018_v56  ;;  %v997_v62 = vadd.f32 %v996_v14, %v2336_v42 }
 0x3a9   : > { %v998_v63 = vadd.f32 %v2332_v41, %v997_v62  ;;  %v1034_v5 = vadd.f32 %v1033_v57, %v1019_v29 }
 0x3ab   : > { %v999_v27 = vadd.f32 %v998_v63, %v2350_v0  ;;  %v1035_v12 = vadd.f32 %v1034_v5, %v1020_v17 }
 0x3ad   : > { %v1000_v30 = vadd.f32 %v2345_v2, %v999_v27  ;;  %v1036_v31 = vadd.f32 %v1035_v12, %v1021_v61 }
 0x3af   : > { %v1001_v18 = vadd.f32 %v1000_v30, %v979_v34  ;;  %v1037_v20 = vadd.f32 %v1036_v31, %v1022_v16 }
 0x3b1   : > { %v1002_v25 = vadd.f32 %v2359_v21, %v1001_v18  ;;  %v1038_v9 = vadd.f32 %v1037_v20, %v1023_v32 }
 0x3b3   : > { %v1003_v26 = vrot.slane %v1002_v25, 4  ;;  %v1039_v19 = vadd.f32 %v1038_v9, %v1024_v24 }
 0x3b5   : > { %v1004_v8 = vadd.f32 %v1003_v26, %v1002_v25  ;;  %v1040_v40 = vrot.slane %v1039_v19, 4 }
 0x3b7   : > { %v1005_v28 = vrot.slane %v1004_v8, 2  ;;  %v1041_v35 = vadd.f32 %v1040_v40, %v1039_v19 }
 0x3b9   : > { %v1006_v54 = vadd.f32 %v1005_v28, %v1004_v8  ;;  %v1042_v11 = vrot.slane %v1041_v35, 2 }
 0x3bb   : > { %v1007_v53 = vrot.slane %v1006_v54, 1  ;;  %v1043_v39 = vadd.f32 %v1042_v11, %v1041_v35 }
 0x3bd   : > { %v1008_v59 = vadd.f32 %v1007_v53, %v1006_v54  ;;  %v1044_v7 = vrot.slane %v1043_v39, 1 }
 0x3bf   : > { %v1045_v43 = vadd.f32 %v1044_v7, %v1043_v39  ;;  %v1046_v58 = vmul.f32 0.0078125, %v1008_v59 }
 0x3c1   : > { %v1047_v6 = vmul.f32 0.0078125, %v1045_v43  ;;  %v1048_v45 = vmul.f32 %v1046_v58, %v1046_v58 }
 0x3c3   : > { %v1049_v47 = vsub.f32 %v1047_v6, %v1048_v45 }
 0x3c5   : > { %v1053_v23 = vadd.f32 1e-05, %v1049_v47 }
 0x3c7   : > { %1690 = vrsqrt.f32 %v1053_v23 }
 0x3d1   : > { %v1691_v48 = vpop.eup %1690 }
 0x3d2   : > { %v1055_v49 = vmul.f32 %v1691_v48, %v1240_v13 }
 0x3d4   : > { %v1056_v51 = vmul.f32 %v1055_v49, %v1046_v58  ;;  %v1061_v52 = vrot.slane %v1055_v49, %v2147_v1 }
 0x3d6   : > { %v1057_v55 = vsub.f32 %v1241_v50, %v1056_v51  ;;  %v1076_v46 = vmul.f32 %v1061_v52, %v979_v34  ;;  %v1062_v56 = vmul.f32 %v1061_v52, %v2322_v33  ;;  %v1063_v14 = vmul.f32 %v2316_v36, %v1061_v52 }
 0x3d7   : > { %v1064_v44 = vmul.f32 %v1061_v52, %v2334_v3  ;;  %v1065_v29 = vmul.f32 %v2330_v37, %v1061_v52  ;;  %v1066_v57 = vmul.f32 %v1061_v52, %v2348_v15  ;;  %v1067_v62 = vmul.f32 %v2343_v38, %v1061_v52 }
 0x3d8   : > { %v1081_v17 = vrot.slane %v1057_v55, %v2147_v1  ;;  %v1068_v63 = vmul.f32 %v1061_v52, %v2362_v4  ;;  %v1069_v5 = vmul.f32 %v2357_v10, %v1061_v52  ;;  %v1070_v34 = vmul.f32 %v1061_v52, %v2324_v22 }
 0x3d9   : > { %v1071_v33 = vmul.f32 %v2318_v60, %v1061_v52  ;;  %v1072_v36 = vmul.f32 %v1061_v52, %v2336_v42  ;;  %v1073_v3 = vmul.f32 %v2332_v41, %v1061_v52  ;;  %v1074_v37 = vmul.f32 %v1061_v52, %v2350_v0 }
 0x3da   : > { %v1096_v61 = vadd.f32 %v1081_v17, %v1076_v46  ;;  %v1075_v38 = vmul.f32 %v2345_v2, %v1061_v52  ;;  %v1077_v1 = vmul.f32 %v2359_v21, %v1061_v52  ;;  %v1082_v15 = vadd.f32 %v1081_v17, %v1062_v56 }
 0x3db   : > { %v1083_v4 = vadd.f32 %v1081_v17, %v1063_v14  ;;  %v1084_v27 = vadd.f32 %v1081_v17, %v1064_v44  ;;  %v1085_v10 = vadd.f32 %v1081_v17, %v1065_v29  ;;  %v1086_v22 = vadd.f32 %v1081_v17, %v1066_v57 }
 0x3dc   : > { %v1112_v12 = vmax.f32 %v1096_v61, 0.0  ;;  %v1087_v60 = vadd.f32 %v1081_v17, %v1067_v62  ;;  %v1088_v16 = vadd.f32 %v1081_v17, %v1068_v63  ;;  %v1089_v42 = vadd.f32 %v1081_v17, %v1069_v5 }
 0x3dd   : > { %v1090_v30 = vadd.f32 %v1081_v17, %v1070_v34  ;;  %v1091_v41 = vadd.f32 %v1081_v17, %v1071_v33  ;;  %v1092_v31 = vadd.f32 %v1081_v17, %v1072_v36  ;;  %v1093_v0 = vadd.f32 %v1081_v17, %v1073_v3 }
 0x3de   : > { %1128 = vst [vmem:[%s2416_s30 + $0x70] sm:$0xff] %v1112_v12  ;;  %v1094_v2 = vadd.f32 %v1081_v17, %v1074_v37  ;;  %v1095_v21 = vadd.f32 %v1081_v17, %v1075_v38  ;;  %v1097_v18 = vadd.f32 %v1081_v17, %v1077_v1  ;;  %v1098_v32 = vmax.f32 %v1082_v15, 0.0 }
 0x3df   : > { %v1099_v20 = vmax.f32 %v1083_v4, 0.0  ;;  %v1100_v24 = vmax.f32 %v1084_v27, 0.0  ;;  %v1101_v25 = vmax.f32 %v1085_v10, 0.0  ;;  %v1102_v9 = vmax.f32 %v1086_v22, 0.0 }
 0x3e0   : > { %v1103_v26 = vmax.f32 %v1087_v60, 0.0  ;;  %v1104_v19 = vmax.f32 %v1088_v16, 0.0  ;;  %v1105_v8 = vmax.f32 %v1089_v42, 0.0  ;;  %v1106_v40 = vmax.f32 %v1090_v30, 0.0  ;;  %1114 = vst [vmem:[%s2416_s30] sm:$0xff] %v1098_v32 }
 0x3e1   : > { %v1107_v28 = vmax.f32 %v1091_v41, 0.0  ;;  %v1108_v35 = vmax.f32 %v1092_v31, 0.0  ;;  %v1109_v54 = vmax.f32 %v1093_v0, 0.0  ;;  %v1110_v11 = vmax.f32 %v1094_v2, 0.0  ;;  %1115 = vst [vmem:[%s2416_s30 + $0x8] sm:$0xff] %v1099_v20  ;;  %1116 = vst [vmem:[%s2416_s30 + $0x10] sm:$0xff] %v1100_v24 }
 0x3e2   : > { %1117 = vst [vmem:[%s2416_s30 + $0x18] sm:$0xff] %v1101_v25  ;;  %1118 = vst [vmem:[%s2416_s30 + $0x20] sm:$0xff] %v1102_v9  ;;  %v1111_v53 = vmax.f32 %v1095_v21, 0.0  ;;  %v1113_v39 = vmax.f32 %v1097_v18, 0.0 }
 0x3e3   : > { %1119 = vst [vmem:[%s2416_s30 + $0x28] sm:$0xff] %v1103_v26  ;;  %1120 = vst [vmem:[%s2416_s30 + $0x30] sm:$0xff] %v1104_v19 }
 0x3e4   : > { %1121 = vst [vmem:[%s2416_s30 + $0x38] sm:$0xff] %v1105_v8  ;;  %1122 = vst [vmem:[%s2416_s30 + $0x40] sm:$0xff] %v1106_v40 }
 0x3e5   : > { %1123 = vst [vmem:[%s2416_s30 + $0x48] sm:$0xff] %v1107_v28  ;;  %1124 = vst [vmem:[%s2416_s30 + $0x50] sm:$0xff] %v1108_v35 }
 0x3e6   : > { %1125 = vst [vmem:[%s2416_s30 + $0x58] sm:$0xff] %v1109_v54  ;;  %1126 = vst [vmem:[%s2416_s30 + $0x60] sm:$0xff] %v1110_v11 }
 0x3e7   : > { %1127 = vst [vmem:[%s2416_s30 + $0x68] sm:$0xff] %v1111_v53  ;;  %1129 = vst [vmem:[%s2416_s30 + $0x78] sm:$0xff] %v1113_v39 }
 0x3e8   : > { %1763 = shalt.err (!%p1760_p7)
}
 0x3e9   : > { %s1764_s25 = scalar_lea.hbm %s2429_s26, 2048  ;;  %s1768_s27 = scalar_lea.hbm %s2488_s3, 4096 }
 0x3ea   : > { %p1765_p9 = scmp.ne.s32.totalorder %s2429_s26, %s1764_s25  ;;  %p1769_p5 = scmp.lt.u32.totalorder %s2429_s26, %s2488_s3 }
 0x3eb   : > { %p1770_p11 = scmp.lt.u32.totalorder %s1768_s27, %s1764_s25  ;;  %p1772_p4 = scmp.lt.u32.totalorder %s1764_s25, %s2429_s26 }
 0x3ec   : > { %p1766_p1 = pnand %p1765_p9, %p1943_p12 }
 0x3ed   : > { %p1771_p2 = por %p1770_p11, %p1769_p5 }
 0x3ee   : > { %p1767_p0 = pneg %p1766_p1 }
 0x3ef   : > { %p1773_p6 = por %p1772_p4, %p1771_p2 }
 0x3f1   : > { %p1774_p8 = pnand %p1773_p6, %p1767_p0 }
 0x3f3   : > { %1777 = shalt.err (!%p1774_p8)
}
 0x3f4   : > { %s1827_s29 = smov 128   ;;  %s1828_s30 = smov 8  }
 0x3f5   : > { %1631 = dma.vmem_to_hbm [thread:$0]  (%p1943_p12), %s2431_s10, 2048, %s2429_s26, %s1131_s18, %s1827_s29, %s1827_s29, %s1828_s30  }
 0x3f6 PF: > { %s1159_s22 = sand.u32 1, %s1808_s12   ;;  %p2503_p10 = scmp.ne.s32.totalorder %s2493_s19, 0 }
 0x3f7   : > { %p2504_p13 = scmp.ge.s32.totalorder %s1820_s15, 2  ;;  %s1160_s16 = scalar_lea.sflag [#allocation4], %s1159_s22 }
 0x3f9   : > { %p1642_p3 = pnand %p2504_p13, %p2503_p10 }
 0x3fb   : > { %1803 = dma.done.wait (!%p1642_p3), %s1160_s16, 2048  }
 0x3fc   : > { %1805 = vsyncadd (!%p1642_p3), %s1160_s16, 4294965248  ;;  %p17_p7 = scmp.ge.s32.totalorder %s1905_s24, 4   ;;  %s2505_s12 = smov %s1812_s13 }
 0x3fd   : > { %s2506_s13 = smov %s1816_s14  ;;  %s2507_s14 = smov %s1939_s17 }
 0x3fe   : > { %s2508_s15 = smov %s1905_s24  ;;  %19 = sbr.rel (!%p17_p7) target bundleno = 6 (0x6), region = 85 }
 0x405   :  { %1165 = vsyncpa [#allocation3], 1 }
 0x406   :  { %1167 = vsyncpa [#allocation3 + $0x1], 1 }
 0x407   :  { %1168 = vsyncpa [#allocation6], 1 }
 0x408   :  { %1169 = vsyncpa [#allocation4], 1 }
 0x409   :  { %1171 = vsyncpa [#allocation4 + $0x1], 1 }

</bundles_post_ra>
